<compile_context>
chip_gen: v7x
topology: tpu7x:2x2x1
jax: 0.10.0
libtpu: 0.0.40
codegen_flags: <defaults>
</compile_context>

<pallas_src>
import functools

import jax
import jax.numpy as jnp
from jax.experimental import pallas as pl
from jax.experimental.pallas import tpu as pltpu


def _round_up(x, m):
    return ((x + m - 1) // m) * m


def _embed_kernel(ids_ref, w_hi_ref, w_lo_ref, out_ref, *, k, v_pad):
    # ids_ref:  (r_tile, k) int32     -- ids_ref[r, g] is the id for packed row r, lane-group g
    # w_hi_ref: (k*v_pad, k*n_dim) bf16 block-diagonal table, hi part (resident)
    # w_lo_ref: (k*v_pad, k*n_dim) bf16 block-diagonal table, lo part (resident)
    # out_ref:  (r_tile, k*n_dim) f32  -- lane-dense packed embeddings
    r_tile = out_ref.shape[0]
    lanes = k * v_pad
    cols = jax.lax.broadcasted_iota(jnp.int32, (r_tile, lanes), 1)

    # Per-lane expected id: lane l (group g = l // v_pad) expects ids[r, g] + g*v_pad.
    # Built with (k-1) selects, then a single compare + single cast straight to bf16.
    expect = ids_ref[:, 0:1]                      # (r_tile, 1); group 0, no offset
    for g in range(1, k):
        expect = jnp.where(cols >= g * v_pad, ids_ref[:, g:g + 1] + g * v_pad, expect)
    onehot = (expect == cols).astype(jnp.bfloat16)   # exact 0/1 in bf16

    # Two bf16 MXU passes, f32 accumulation: exact-ish f32 table reconstruction.
    acc = jnp.dot(onehot, w_hi_ref[...], preferred_element_type=jnp.float32)
    acc = acc + jnp.dot(onehot, w_lo_ref[...], preferred_element_type=jnp.float32)
    out_ref[...] = acc.astype(out_ref.dtype)


def context_embedding(event_ids, table, *, tile_n=None, vmem_budget_bytes=16 << 20):
    """event_ids: int array of any shape; table: (num_classes+1, n_dim) float.

    Returns float32 embeddings of shape (*event_ids.shape, n_dim) == table[event_ids].
    """
    V, n_dim = table.shape
    orig_shape = event_ids.shape
    ids = jnp.asarray(event_ids, dtype=jnp.int32).reshape(-1)
    n = ids.shape[0]
    if n == 0:
        return jnp.zeros((*orig_shape, n_dim), jnp.float32)

    # Clamp to the valid id range (torch would raise on OOB; clamping avoids the
    # one-hot trick's cross-group aliasing failure mode).
    ids = jnp.clip(ids, 0, V - 1)

    # Lane-packing factor: pack k ids per 128-lane output row when possible.
    if n_dim < 128 and 128 % n_dim == 0:
        k = 128 // n_dim
    else:
        k = 1   # n_dim >= 128 (or awkward): correct, but stores may be masked.

    v_pad = _round_up(V, 16)     # contraction dim: sublane multiple for bf16 packing
    row_group = 8 * k            # tile_n must be a multiple of this

    # bf16 hi/lo split of the table (hi + lo reconstructs f32 to ~2^-18 rel error).
    tab_f32 = table.astype(jnp.float32)
    tab_hi = tab_f32.astype(jnp.bfloat16)
    tab_lo = (tab_f32 - tab_hi.astype(jnp.float32)).astype(jnp.bfloat16)

    def block_diag(t):
        z = jnp.zeros((k * v_pad, k * n_dim), t.dtype)
        for g in range(k):
            z = z.at[g * v_pad:g * v_pad + V, g * n_dim:(g + 1) * n_dim].set(t)
        return z

    w_hi = block_diag(tab_hi)
    w_lo = block_diag(tab_lo)
    # TODO(synk): large-V path — tile the class dim (reduction grid axis + f32
    # accumulator) instead of a resident block-diagonal table.

    n_rounded = _round_up(n, row_group)

    if tile_n is None:
        # VMEM per PACKED row (one packed row = k original rows), counting the
        # 128-lane padding of every block explicitly (fixes the old >100x undercount).
        out_lanes = _round_up(k * n_dim, 128)
        oh_lanes = _round_up(k * v_pad, 128)
        per_packed_row = (
            2 * 128 * 4            # ids block: int32, lane-padded to 128, double-buffered
            + 2 * out_lanes * 4    # f32 output block, double-buffered
            + 2 * oh_lanes * 2     # bf16 one-hot slab (+ slack)
            + 2 * oh_lanes * 4     # int32 iota / expected-id slabs
        )
        r_tile_max = max(8, vmem_budget_bytes // per_packed_row)
        tile_n = min(8192, r_tile_max * k)
        tile_n = max(row_group, (tile_n // row_group) * row_group)
        # v7x: keep >= ~4 grid steps (when N allows) so the "parallel" axis
        # actually shards across the 2 TensorCores.
        steps_target = 4
        steps_cap = max(row_group, _round_up(-(-n_rounded // steps_target), row_group))
        tile_n = min(tile_n, steps_cap)
    else:
        tile_n = max(row_group, (tile_n // row_group) * row_group)

    tile_n = min(tile_n, n_rounded)
    n_pad = _round_up(n, tile_n)

    ids_p = ids if n_pad == n else jnp.pad(ids, (0, n_pad - n))   # pad with valid id 0
    ids2 = ids_p.reshape(n_pad // k, k)        # ids2[r, g] = ids_p[r*k + g]

    r_tile = tile_n // k
    out_packed = pl.pallas_call(
        functools.partial(_embed_kernel, k=k, v_pad=v_pad),
        out_shape=jax.ShapeDtypeStruct((n_pad // k, k * n_dim), jnp.float32),
        grid_spec=pltpu.PrefetchScalarGridSpec(
            num_scalar_prefetch=0,
            grid=(n_pad // tile_n,),
            in_specs=[
                pl.BlockSpec((r_tile, k), lambda i: (i, 0)),
                # Constant block index -> tables fetched once, resident in VMEM.
                pl.BlockSpec((k * v_pad, k * n_dim), lambda i: (0, 0)),
                pl.BlockSpec((k * v_pad, k * n_dim), lambda i: (0, 0)),
            ],
            out_specs=pl.BlockSpec((r_tile, k * n_dim), lambda i: (i, 0)),
        ),
        compiler_params=pltpu.CompilerParams(
            dimension_semantics=("parallel",),
            vmem_limit_bytes=32 << 20,
        ),
    )(ids2, w_hi, w_lo)

    # (n_pad//k, k*n_dim) -> (n_pad, n_dim): contiguous row-major reshape (free).
    out = out_packed.reshape(n_pad, n_dim)
    if n_pad != n:
        out = out[:n]
    return out.reshape(*orig_shape, n_dim)


if __name__ == "__main__":
    num_classes = 40
    n_dim = 32
    V = num_classes + 1

    key = jax.random.PRNGKey(0)
    k_tab, k_ids_a, k_ids_b = jax.random.split(key, 3)
    # torch.nn.Embedding(num_classes + 1, n_dim) weight ~ N(0, 1)
    table = jax.random.normal(k_tab, (V, n_dim), dtype=jnp.float32)

    # Case 1: batch=2, seq=16 -> N=32 rows (no padding, lane-packed k=4 path).
    ids_a = jax.random.randint(k_ids_a, (2, 16), minval=0, maxval=V, dtype=jnp.int32)
    out_a = jax.block_until_ready(context_embedding(ids_a, table))
    ref_a = table[ids_a]
    assert out_a.shape == (2, 16, n_dim)
    assert out_a.dtype == jnp.float32
    assert jnp.allclose(out_a, ref_a, rtol=1e-5, atol=2e-5), float(jnp.max(jnp.abs(out_a - ref_a)))

    # Case 2: ragged N = 3*7 = 21 rows -> exercises padding + post-slice path.
    ids_b = jax.random.randint(k_ids_b, (3, 7), minval=0, maxval=V, dtype=jnp.int32)
    out_b = jax.block_until_ready(context_embedding(ids_b, table))
    ref_b = table[ids_b]
    assert out_b.shape == (3, 7, n_dim)
    assert jnp.allclose(out_b, ref_b, rtol=1e-5, atol=2e-5), float(jnp.max(jnp.abs(out_b - ref_b)))

    print("KERNEL_OK")
</pallas_src>

<mosaic_0001>
module attributes {stable_mosaic.version = 11 : i64} {
  func.func @_embed_kernel(%arg0: i32, %arg1: memref<8x4xi32, #tpu.memory_space<vmem>>, %arg2: memref<192x128xbf16, #tpu.memory_space<vmem>>, %arg3: memref<192x128xbf16, #tpu.memory_space<vmem>>, %arg4: memref<8x128xf32, #tpu.memory_space<vmem>>) attributes {dimension_semantics = [#tpu.dimension_semantics<parallel>], iteration_bounds = array<i64: 1>, scalar_prefetch = 0 : i64, scratch_operands = 0 : i64, tpu.core_type = #tpu.core_type<tc>, window_params = [{transform_indices = @transform_0, window_bounds = array<i64: 8, 4>}, {pipeline_mode = #tpu.pipeline_mode<synchronous>, transform_indices = @transform_1, window_bounds = array<i64: 192, 128>}, {pipeline_mode = #tpu.pipeline_mode<synchronous>, transform_indices = @transform_2, window_bounds = array<i64: 192, 128>}, {transform_indices = @transform_3, window_bounds = array<i64: 8, 128>}]} {
    %0 = tpu.iota {dimensions = array<i32: 1>} : vector<8x192xi32>
    %c0 = arith.constant 0 : index
    %c0_0 = arith.constant 0 : index
    %1 = vector.load %arg1[%c0, %c0_0] : memref<8x4xi32, #tpu.memory_space<vmem>>, vector<8x1xi32>
    %c48_i32 = arith.constant 48 : i32
    %2 = vector.broadcast %c48_i32 : i32 to vector<8x192xi32>
    %3 = arith.cmpi sge, %0, %2 : vector<8x192xi32>
    %c0_1 = arith.constant 0 : index
    %c1 = arith.constant 1 : index
    %4 = vector.load %arg1[%c0_1, %c1] : memref<8x4xi32, #tpu.memory_space<vmem>>, vector<8x1xi32>
    %c48_i32_2 = arith.constant 48 : i32
    %5 = vector.broadcast %c48_i32_2 : i32 to vector<8x1xi32>
    %6 = arith.addi %4, %5 : vector<8x1xi32>
    %7 = vector.shape_cast %6 : vector<8x1xi32> to vector<8x1xi32>
    %8 = vector.broadcast %7 : vector<8x1xi32> to vector<8x192xi32>
    %9 = vector.shape_cast %1 : vector<8x1xi32> to vector<8x1xi32>
    %10 = vector.broadcast %9 : vector<8x1xi32> to vector<8x192xi32>
    %11 = arith.select %3, %8, %10 : vector<8x192xi1>, vector<8x192xi32>
    %c96_i32 = arith.constant 96 : i32
    %12 = vector.broadcast %c96_i32 : i32 to vector<8x192xi32>
    %13 = arith.cmpi sge, %0, %12 : vector<8x192xi32>
    %c0_3 = arith.constant 0 : index
    %c2 = arith.constant 2 : index
    %14 = vector.load %arg1[%c0_3, %c2] : memref<8x4xi32, #tpu.memory_space<vmem>>, vector<8x1xi32>
    %c96_i32_4 = arith.constant 96 : i32
    %15 = vector.broadcast %c96_i32_4 : i32 to vector<8x1xi32>
    %16 = arith.addi %14, %15 : vector<8x1xi32>
    %17 = vector.shape_cast %16 : vector<8x1xi32> to vector<8x1xi32>
    %18 = vector.broadcast %17 : vector<8x1xi32> to vector<8x192xi32>
    %19 = arith.select %13, %18, %11 : vector<8x192xi1>, vector<8x192xi32>
    %c144_i32 = arith.constant 144 : i32
    %20 = vector.broadcast %c144_i32 : i32 to vector<8x192xi32>
    %21 = arith.cmpi sge, %0, %20 : vector<8x192xi32>
    %c0_5 = arith.constant 0 : index
    %c3 = arith.constant 3 : index
    %22 = vector.load %arg1[%c0_5, %c3] : memref<8x4xi32, #tpu.memory_space<vmem>>, vector<8x1xi32>
    %c144_i32_6 = arith.constant 144 : i32
    %23 = vector.broadcast %c144_i32_6 : i32 to vector<8x1xi32>
    %24 = arith.addi %22, %23 : vector<8x1xi32>
    %25 = vector.shape_cast %24 : vector<8x1xi32> to vector<8x1xi32>
    %26 = vector.broadcast %25 : vector<8x1xi32> to vector<8x192xi32>
    %27 = arith.select %21, %26, %19 : vector<8x192xi1>, vector<8x192xi32>
    %28 = arith.cmpi eq, %27, %0 : vector<8x192xi32>
    %29 = arith.extui %28 : vector<8x192xi1> to vector<8x192xi32>
    %30 = arith.sitofp %29 : vector<8x192xi32> to vector<8x192xf32>
    %31 = arith.truncf %30 : vector<8x192xf32> to vector<8x192xbf16>
    %c0_7 = arith.constant 0 : index
    %c0_8 = arith.constant 0 : index
    %32 = vector.load %arg2[%c0_7, %c0_8] : memref<192x128xbf16, #tpu.memory_space<vmem>>, vector<192x128xbf16>
    %cst = arith.constant dense<0.000000e+00> : vector<8x128xf32>
    %33 = tpu.matmul %31, %32, %cst {dimension_numbers = #tpu.dot_dimension_numbers<[1], [0], [0], [1], [0, 0, 1, 1], [], []>} : vector<8x192xbf16>, vector<192x128xbf16>, vector<8x128xf32> -> vector<8x128xf32>
    %c0_9 = arith.constant 0 : index
    %c0_10 = arith.constant 0 : index
    %34 = vector.load %arg3[%c0_9, %c0_10] : memref<192x128xbf16, #tpu.memory_space<vmem>>, vector<192x128xbf16>
    %cst_11 = arith.constant dense<0.000000e+00> : vector<8x128xf32>
    %35 = tpu.matmul %31, %34, %cst_11 {dimension_numbers = #tpu.dot_dimension_numbers<[1], [0], [0], [1], [0, 0, 1, 1], [], []>} : vector<8x192xbf16>, vector<192x128xbf16>, vector<8x128xf32> -> vector<8x128xf32>
    %36 = arith.addf %33, %35 : vector<8x128xf32>
    %c0_12 = arith.constant 0 : index
    %c0_13 = arith.constant 0 : index
    %37 = vector.load %arg4[%c0_12, %c0_13] : memref<8x128xf32, #tpu.memory_space<vmem>>, vector<8x128xf32>
    tpu.vector_store %arg4[%c0_12, %c0_13], %36 {strides = array<i32>} : memref<8x128xf32, #tpu.memory_space<vmem>>, vector<8x128xf32>,
    return
  }
  func.func @transform_0(%arg0: i32) -> (i32, i32) {
    %c0_i32 = arith.constant 0 : i32
    %c0_i32_0 = arith.constant 0 : i32
    return %arg0, %c0_i32 : i32, i32
  }
  func.func @transform_1(%arg0: i32) -> (i32, i32) {
    %c0_i32 = arith.constant 0 : i32
    %c0_i32_0 = arith.constant 0 : i32
    %c0_i32_1 = arith.constant 0 : i32
    return %c0_i32, %c0_i32_0 : i32, i32
  }
  func.func @transform_2(%arg0: i32) -> (i32, i32) {
    %c0_i32 = arith.constant 0 : i32
    %c0_i32_0 = arith.constant 0 : i32
    %c0_i32_1 = arith.constant 0 : i32
    return %c0_i32, %c0_i32_0 : i32, i32
  }
  func.func @transform_3(%arg0: i32) -> (i32, i32) {
    %c0_i32 = arith.constant 0 : i32
    %c0_i32_0 = arith.constant 0 : i32
    return %arg0, %c0_i32 : i32, i32
  }
}

</mosaic_0001>

<bundles_post_ra>
// kernel: tpu_custom_call.1
= control target key start
LH: loop header
LB: loop body
LE: loop exit
PB: predicated region body
PF: predicated region fallthrough
CT: control target
= control target key end

     0   :  { %8 = vsyncpa [#allocation3], 0  ;;  %s615_s0 = inlined_call_operand.vmem [shape: s32[8,4], index: 0, kind: input, shape index: {}]   ;;  %s616_s1 = inlined_call_operand.hbm [shape: bf16[192,128], index: 1, kind: input, shape index: {}]   ;;  %s617_s2 = inlined_call_operand.hbm [shape: bf16[192,128], index: 2, kind: input, shape index: {}]   ;;  %s618_s3 = inlined_call_operand.hbm [shape: f32[8,128], index: 3, kind: output, shape index: {}]  }
   0x1   :  { %9 = vsyncpa [#allocation6], 0 }
   0x2   :  { %10 = vsyncpa [#allocation4], 0  ;;  %s520_s12 = smov [#allocation2]   ;;  %s448_s16 = scalar_lea.hbm %s616_s1, 1536 }
   0x3   :  { %s18_s13 = sshll.u32 %s520_s12, 4  ;;  %p449_p0 = scmp.ne.s32.totalorder %s616_s1, %s448_s16  ;;  %s19_s13 = int_to_ptr.vmem [resolvable:$true] %s18_s13 }
   0x4   :  { %p452_p1 = scmp.lt.u32.totalorder %s448_s16, %s616_s1 }
   0x6   :  { %p454_p2 = pnand %p452_p1, %p449_p0 }
   0x8   :  { %457 = shalt.err (!%p454_p2)
}
   0x9   :  { %s458_s21 = scalar_lea.vmem %s19_s13, 1536  ;;  %p463_p4 = scmp.lt.s32.totalorder %s19_s13, %s19_s13 }
   0xa   :  { %p459_p3 = scmp.ne.s32.totalorder %s19_s13, %s458_s21  ;;  %p464_p5 = scmp.lt.s32.totalorder %s458_s21, %s458_s21 }
   0xc   :  { %p465_p6 = por %p464_p5, %p463_p4 }
   0xe   :  { %p466_p7 = pnand %p465_p6, %p459_p3 }
  0x10   :  { %469 = shalt.err (!%p466_p7)
}
  0x11   :  { %s521_s22 = smov 64   ;;  %s522_s23 = smov 4  }
  0x12   :  { %24 = dma.hbm_to_vmem [thread:$0]  %s616_s1, 1536, %s19_s13, [#allocation3], %s521_s22, %s521_s22, %s522_s23  }
  0x13   :  { %s523_s26 = smov [#allocation5]   ;;  %s470_s30 = scalar_lea.hbm %s617_s2, 1536 }
  0x14   :  { %s30_s27 = sshll.u32 %s523_s26, 4  ;;  %p471_p8 = scmp.ne.s32.totalorder %s617_s2, %s470_s30  ;;  %s31_s27 = int_to_ptr.vmem [resolvable:$true] %s30_s27 }
  0x15   :  { %p474_p9 = scmp.lt.u32.totalorder %s470_s30, %s617_s2 }
  0x17   :  { %p476_p10 = pnand %p474_p9, %p471_p8 }
  0x19   :  { %479 = shalt.err (!%p476_p10)
}
  0x1a   :  { %s480_s8 = scalar_lea.vmem %s31_s27, 1536  ;;  %p485_p12 = scmp.lt.s32.totalorder %s31_s27, %s31_s27 }
  0x1b   :  { %p481_p11 = scmp.ne.s32.totalorder %s31_s27, %s480_s8  ;;  %p486_p13 = scmp.lt.s32.totalorder %s480_s8, %s480_s8 }
  0x1d   :  { %p487_p0 = por %p486_p13, %p485_p12 }
  0x1f   :  { %p488_p1 = pnand %p487_p0, %p481_p11 }
  0x21   :  { %491 = shalt.err (!%p488_p1)
}
  0x22   :  { %36 = dma.hbm_to_vmem [thread:$0]  %s617_s2, 1536, %s31_s27, [#allocation6], %s521_s22, %s521_s22, %s522_s23  }
  0x23   :  { %514 = dma.done.wait [#allocation3], 1536  }
  0x24   :  { %515 = vsyncadd [#allocation3], 4294965760 }
  0x25   :  { %516 = dma.done.wait [#allocation6], 1536  }
  0x26   :  { %517 = vsyncadd [#allocation6], 4294965760  ;;  %v524_v0 = vmov 2   ;;  %v525_v1 = vmov 1   ;;  %v526_v2 = vmov 0   ;;  %v47_v3 = vld [vmem:[%s615_s0] sm:$0xff]  ;;  %v44_v32 = vlaneseq }
  0x27   :  { %420 = vset.pattern.permute.xlu0 %v524_v0  ;;  %422 = vset.pattern.permute.xlu1 %v525_v1  ;;  %v61_v4 = vadd.s32 96, %v47_v3  ;;  %v50_v5 = vadd.s32 48, %v47_v3  ;;  %v424_v6 = vld [vmem:[#allocation5] sm:$0xff]   ;;  %v69_v8 = vadd.s32 144, %v47_v3  ;;  %v426_v9 = vld [vmem:[#allocation5 + $0x8] sm:$0xff]   ;;  %v527_v11 = vmov 3  }
  0x28   :  { %207 = vmatprep.subr.bf16.mxu1 %v526_v2  ;;  %319 = vmatprep.subr.bf16.mxu0 %v526_v2  ;;  %v425_v7 = vld [vmem:[#allocation2] sm:$0xff]   ;;  %v427_v10 = vld [vmem:[#allocation2 + $0x8] sm:$0xff]   ;;  %v428_v12 = vld [vmem:[#allocation5 + $0x10] sm:$0xff]   ;;  %v45_v33 = vand.u32 127, %v44_v32  ;;  %v528_v42 = vmov 0.0   ;;  %vm203_vm4 = vcmask 523264  }
  0x29   :  { %63 = vperm.xlu0 %420, %v61_v4   ;;  %52 = vperm.xlu1 %422, %v50_v5   ;;  %v429_v13 = vld [vmem:[#allocation2 + $0x10] sm:$0xff]   ;;  %v430_v14 = vld [vmem:[#allocation5 + $0x18] sm:$0xff]   ;;  %v432_v16 = vld [vmem:[#allocation5 + $0x20] sm:$0xff]   ;;  %v529_v45 = vmov 1.0|1.0   ;;  %s530_s0 = smov [#allocation7]  }
  0x2a   :  { %208 = vmatpush1.bf16.msra.mxu1 %v424_v6  ;;  %320 = vmatpush1.bf16.msra.mxu0 %v425_v7  ;;  %v431_v15 = vld [vmem:[#allocation2 + $0x18] sm:$0xff]   ;;  %v433_v17 = vld [vmem:[#allocation2 + $0x20] sm:$0xff]   ;;  %v434_v18 = vld [vmem:[#allocation5 + $0x28] sm:$0xff]   ;;  %v46_v34 = vadd.s32 128, %v45_v33  ;;  %vm48_vm1 = vcmp.ge.s32.totalorder %v45_v33, 48  ;;  %vm59_vm2 = vcmp.ge.s32.totalorder %v45_v33, 96 }
  0x2b   :  { %209 = vmatprep.subr.bf16.mxu1 %v526_v2  ;;  %321 = vmatprep.subr.bf16.mxu0 %v526_v2  ;;  %v435_v19 = vld [vmem:[#allocation2 + $0x28] sm:$0xff]   ;;  %v436_v20 = vld [vmem:[#allocation5 + $0x30] sm:$0xff]   ;;  %v438_v22 = vld [vmem:[#allocation5 + $0x38] sm:$0xff]   ;;  %s366_s2 = sshll.u32 %s530_s0, 4  ;;  %s367_s2 = int_to_ptr.vmem [resolvable:$true] %s366_s2 }
  0x2c   :  { %v437_v21 = vld [vmem:[#allocation2 + $0x30] sm:$0xff]   ;;  %v439_v23 = vld [vmem:[#allocation2 + $0x38] sm:$0xff]   ;;  %v440_v24 = vld [vmem:[#allocation5 + $0x40] sm:$0xff]   ;;  %vm68_vm0 = vcmp.ge.s32.totalorder %v46_v34, 144  ;;  %s492_s12 = scalar_lea.vmem %s367_s2, 128  ;;  %p497_p3 = scmp.lt.s32.totalorder %s367_s2, %s367_s2 }
  0x2d   :  { %421 = vset.pattern.permute.xlu0 %v527_v11  ;;  %423 = vset.pattern.permute.xlu1 %v526_v2  ;;  %v441_v25 = vld [vmem:[#allocation2 + $0x40] sm:$0xff]   ;;  %v442_v26 = vld [vmem:[#allocation5 + $0x48] sm:$0xff]   ;;  %v444_v28 = vld [vmem:[#allocation5 + $0x50] sm:$0xff]   ;;  %p493_p2 = scmp.ne.s32.totalorder %s367_s2, %s492_s12  ;;  %p498_p4 = scmp.lt.s32.totalorder %s492_s12, %s492_s12 }
  0x2e   :  { %71 = vperm.xlu0 %421, %v69_v8   ;;  %55 = vperm.xlu1 %423, %v47_v3   ;;  %v443_v27 = vld [vmem:[#allocation2 + $0x48] sm:$0xff]   ;;  %v445_v29 = vld [vmem:[#allocation2 + $0x50] sm:$0xff]   ;;  %v446_v30 = vld [vmem:[#allocation5 + $0x58] sm:$0xff]  }
  0x2f   :  { %210 = vmatpush1.bf16.msra.mxu1 %v426_v9  ;;  %322 = vmatpush1.bf16.msra.mxu0 %v427_v10  ;;  %v447_v31 = vld [vmem:[#allocation2 + $0x58] sm:$0xff]   ;;  %p499_p5 = por %p498_p4, %p497_p3 }
  0x30   :  { %211 = vmatprep.subr.bf16.mxu1 %v526_v2  ;;  %323 = vmatprep.subr.bf16.mxu0 %v526_v2 }
  0x31   :  { %p500_p6 = pnand %p499_p5, %p493_p2 }
  0x33   :  { %212 = vmatpush1.bf16.msra.mxu1 %v428_v12  ;;  %324 = vmatpush1.bf16.msra.mxu0 %v429_v13 }
  0x34   :  { %213 = vmatprep.subr.bf16.mxu1 %v526_v2  ;;  %325 = vmatprep.subr.bf16.mxu0 %v526_v2 }
  0x37   :  { %214 = vmatpush1.bf16.msra.mxu1 %v430_v14  ;;  %326 = vmatpush1.bf16.msra.mxu0 %v431_v15 }
  0x38   :  { %215 = vmatprep.subr.bf16.mxu1 %v526_v2  ;;  %327 = vmatprep.subr.bf16.mxu0 %v526_v2 }
  0x3b   :  { %216 = vmatpush1.bf16.msra.mxu1 %v432_v16  ;;  %328 = vmatpush1.bf16.msra.mxu0 %v433_v17 }
  0x3c   :  { %217 = vmatprep.subr.bf16.mxu1 %v526_v2  ;;  %329 = vmatprep.subr.bf16.mxu0 %v526_v2 }
  0x3f   :  { %218 = vmatpush1.bf16.msra.mxu1 %v434_v18  ;;  %330 = vmatpush1.bf16.msra.mxu0 %v435_v19 }
  0x40   :  { %219 = vmatprep.subr.bf16.mxu1 %v526_v2  ;;  %331 = vmatprep.subr.bf16.mxu0 %v526_v2 }
  0x43   :  { %220 = vmatpush1.bf16.msra.mxu1 %v436_v20  ;;  %332 = vmatpush1.bf16.msra.mxu0 %v437_v21 }
  0x44   :  { %221 = vmatprep.subr.bf16.mxu1 %v526_v2  ;;  %333 = vmatprep.subr.bf16.mxu0 %v526_v2 }
  0x47   :  { %222 = vmatpush1.bf16.msra.mxu1 %v438_v22  ;;  %334 = vmatpush1.bf16.msra.mxu0 %v439_v23 }
  0x48   :  { %223 = vmatprep.subr.bf16.mxu1 %v526_v2  ;;  %335 = vmatprep.subr.bf16.mxu0 %v526_v2 }
  0x4b   :  { %224 = vmatpush1.bf16.msra.mxu1 %v440_v24  ;;  %336 = vmatpush1.bf16.msra.mxu0 %v441_v25 }
  0x4c   :  { %225 = vmatprep.subr.bf16.mxu1 %v526_v2  ;;  %337 = vmatprep.subr.bf16.mxu0 %v526_v2 }
  0x4f   :  { %226 = vmatpush1.bf16.msra.mxu1 %v442_v26  ;;  %338 = vmatpush1.bf16.msra.mxu0 %v443_v27 }
  0x50   :  { %227 = vmatprep.subr.bf16.mxu1 %v526_v2  ;;  %339 = vmatprep.subr.bf16.mxu0 %v526_v2 }
  0x53   :  { %228 = vmatpush1.bf16.msra.mxu1 %v444_v28  ;;  %340 = vmatpush1.bf16.msra.mxu0 %v445_v29 }
  0x54   :  { %229 = vmatprep.subr.bf16.mxu1 %v526_v2  ;;  %341 = vmatprep.subr.bf16.mxu0 %v526_v2 }
  0x57   :  { %230 = vmatpush1.bf16.msra.mxu1 %v446_v30  ;;  %342 = vmatpush1.bf16.msra.mxu0 %v447_v31 }
  0xa8   :  { %v64_v35 = vpop.permute.xlu0 %63  ;;  %v53_v36 = vpop.permute.xlu1 %52 }
  0xad   :  { %v72_v37 = vpop.permute.xlu0 %71  ;;  %v56_v38 = vpop.permute.xlu1 %55 }
  0xae   :  { %v74_v39 = vsel %vm68_vm0, %v72_v37, %v64_v35  ;;  %v57_v40 = vsel %vm48_vm1, %v53_v36, %v56_v38 }
  0xaf   :  { %v65_v41 = vsel %vm59_vm2, %v64_v35, %v57_v40  ;;  %vm76_vm3 = vcmp.eq.s32.totalorder %v74_v39, %v46_v34 }
  0xb0   :  { %v377_v43 = vsel %vm76_vm3, 1.0, %v528_v42  ;;  %vm75_vm5 = vcmp.eq.s32.totalorder %v65_v41, %v45_v33 }
  0xb1   :  { %v82_v44 = vpack.c.bf16 %v377_v43, %v377_v43  ;;  %vm391_vm6 = vmpackc.low %vm75_vm5, %vm75_vm5 }
  0xb3   :  { %390 = vmatprep.mubr.msk.bf16.mxu1 %vm203_vm4, %v82_v44  ;;  %405 = vmatprep.mubr.msk.bf16.mxu0 %vm203_vm4, %v82_v44 }
  0xb4   :  { %392 = vmatmul.mubr.msk.bf16.vlgmr.msra.gmra.mrb[0].mxu1 %vm391_vm6, %v529_v45  ;;  %407 = vmatmul.mubr.msk.bf16.vlgmr.msra.gmra.mrb[0].mxu0 %vm391_vm6, %v529_v45 }
 0x187   :  { %v241_v46 = vpop.f32.mrb[0].mxu1  ;;  %v353_v47 = vpop.f32.mrb[0].mxu0 }
 0x188   :  { %v354_v48 = vadd.f32 %v353_v47, %v241_v46  ;;  %v243_v49 = vpop.f32.mrb[1].mxu1  ;;  %v355_v50 = vpop.f32.mrb[1].mxu0 }
 0x189   :  { %v244_v51 = vpop.f32.mrb[2].mxu1  ;;  %v356_v52 = vpop.f32.mrb[2].mxu0 }
 0x18a   :  { %359 = vst [vmem:[#allocation7] sm:$0xff] %v354_v48  ;;  %v245_v53 = vpop.f32.mrb[3].mxu1  ;;  %v357_v54 = vpop.f32.mrb[3].mxu0 }
 0x18b   :  { %503 = shalt.err (!%p500_p6)
}
 0x18c   :  { %s504_s15 = scalar_lea.hbm %s618_s3, 128 }
 0x18d   :  { %p505_p7 = scmp.ne.s32.totalorder %s618_s3, %s504_s15  ;;  %p508_p8 = scmp.lt.u32.totalorder %s504_s15, %s618_s3 }
 0x18f   :  { %p510_p9 = pnand %p508_p8, %p505_p7 }
 0x191   :  { %513 = shalt.err (!%p510_p9)
}
 0x192   :  { %369 = dma.vmem_to_hbm [thread:$0]  %s367_s2, 128, %s618_s3, [#allocation4]  }
 0x193   :  { %518 = dma.done.wait [#allocation4], 128  }
 0x194   :  { %519 = vsyncadd [#allocation4], 4294967168 }
 0x195   :  { %373 = vsyncpa [#allocation3], 1 }
 0x196   :  { %374 = vsyncpa [#allocation6], 1 }
 0x197   :  { %375 = vsyncpa [#allocation4], 1 }

</bundles_post_ra>
